<compile_context>
chip_gen: v6e
topology: v6e:2x2x1
jax: 0.10.0
libtpu: 0.0.40
codegen_flags: <defaults>
</compile_context>

<pallas_src>
import functools

import numpy as np

import jax
import jax.numpy as jnp
from jax.experimental import pallas as pl
from jax.experimental.pallas import tpu as pltpu


# ----------------------------------------------------------------------------
# Pallas kernel: fused (1x1 conv as W @ X) + BN shift + ReLU
# ----------------------------------------------------------------------------
def _conv_bn_relu_kernel(x_ref, w_ref, shift_ref, o_ref):
    # x_ref:     (2*Cin, TN)     compute dtype (bf16 by default)
    # w_ref:     (2*Cout, 2*Cin) compute dtype (BN scale folded in, rows in
    #                            real-block/imag-block order)
    # shift_ref: (2*Cout, 1)     f32 folded BN shift (same row order)
    # o_ref:     (2*Cout, TN)    compute dtype
    y = jnp.dot(w_ref[...], x_ref[...], preferred_element_type=jnp.float32)
    y = jnp.maximum(y + shift_ref[...], 0.0)      # shift broadcasts along lanes
    o_ref[...] = y.astype(o_ref.dtype)


# ----------------------------------------------------------------------------
# Hardware probes (defensive: never fail tracing on unknown platforms)
# ----------------------------------------------------------------------------
def _vmem_capacity_bytes():
    try:
        info = pltpu.get_tpu_info()
        cap = getattr(info, "vmem_capacity_bytes", None)
        if cap:
            return int(cap)
    except Exception:
        pass
    return 64 * 1024 * 1024  # conservative default (v7x-class per-TC VMEM)


def _num_tensorcores():
    """Best-effort TensorCore-per-chip count (v5e/v6e=1, v7x=2)."""
    try:
        info = pltpu.get_tpu_info()
        for attr in ("tensorcores_per_chip", "num_tensorcores", "num_cores"):
            v = getattr(info, attr, None)
            if v:
                return int(v)
    except Exception:
        pass
    try:
        kind = jax.devices()[0].device_kind.lower()
        if "v7" in kind:
            return 2
    except Exception:
        pass
    return 1


def _make_spec(block_shape, index_map, buffer_count=None):
    """BlockSpec with optional pipeline depth; falls back to default buffering."""
    if buffer_count is not None and buffer_count != 2:
        try:
            return pl.BlockSpec(block_shape, index_map,
                                pipeline_mode=pl.Buffered(buffer_count))
        except (TypeError, AttributeError):
            pass
    return pl.BlockSpec(block_shape, index_map)


def _plan(batch, m, cin2, cout2, in_bytes, out_bytes):
    """Pick lane tile TN, VMEM limit and pipeline depths (generation aware)."""
    n_cores = _num_tensorcores()
    vmem_cap = _vmem_capacity_bytes()

    # Grid-invariant weight + shift stay resident; single-buffer them when big
    # enough to matter (their index_map is constant, they are never re-fetched).
    weight_bytes = cout2 * cin2 * in_bytes + cout2 * 4
    w_buffers = 1 if weight_bytes > (1 << 20) else None
    resident = weight_bytes * (w_buffers if w_buffers else 2)

    # Budget for the pipelined column tiles, after the resident operands.
    budget = max(1 << 20, min(vmem_cap // 3, 40 * 1024 * 1024) - resident)
    per_col = cin2 * in_bytes + cout2 * out_bytes     # bytes per lane, per buffer
    tn = 2048
    while tn > 128 and 2 * tn * per_col > budget:
        tn //= 2

    # Megacore (2-TC chips only): prefer an even number (>=2) of parallel grid
    # steps so both TensorCores get balanced halves -- but never drop the lane
    # tile below 512 to manufacture them. Single-TC chips keep the biggest tn.
    if n_cores >= 2:
        while tn > 512 and (batch * pl.cdiv(m, tn)) % 2 != 0:
            tn //= 2

    if m <= tn:
        tn = m                                        # one full-width block per row

    n_steps = batch * pl.cdiv(m, tn)

    # Deepen the x/out pipeline only when tiles are small, there are enough
    # steps to benefit, and VMEM allows it (hides per-step DMA latency).
    io_buffers = None
    if tn <= 512 and n_steps >= 4 and 3 * tn * per_col <= budget:
        io_buffers = 3

    nbuf = io_buffers if io_buffers else 2
    block_bytes = nbuf * tn * per_col
    # Leave more headroom for Mosaic internal scratch on 64 MiB-VMEM parts.
    vmem_frac = 0.6 if vmem_cap <= (64 << 20) else 0.75
    vmem_limit = int(min(vmem_cap * vmem_frac,
                         max(32 << 20, block_bytes + resident + (4 << 20))))
    return tn, vmem_limit, w_buffers, io_buffers


# ----------------------------------------------------------------------------
# Pallas hot-path wrapper
# ----------------------------------------------------------------------------
def conv_bn_relu_pallas(x_bcm, w_scaled, shift, *, compute_dtype=jnp.bfloat16):
    """Fused per-pixel channel matmul + shift + ReLU.

    x_bcm:    (B, 2Cin, M)  spectral activations (NCHW-native, H*Wf folded to M)
    w_scaled: (2Cout, 2Cin) 1x1 conv weight, BN scale folded, rows permuted
    shift:    (2Cout, 1)    folded BN shift (same row order)
    returns:  (B, 2Cout, M) in compute_dtype
    """
    b, cin2, m = x_bcm.shape
    cout2 = w_scaled.shape[0]

    x_bcm = x_bcm.astype(compute_dtype)
    w_scaled = w_scaled.astype(compute_dtype)
    shift = shift.astype(jnp.float32)

    out_dtype = compute_dtype
    in_bytes = jnp.dtype(compute_dtype).itemsize
    out_bytes = jnp.dtype(out_dtype).itemsize

    tn, vmem_limit, w_buffers, io_buffers = _plan(
        b, m, cin2, cout2, in_bytes, out_bytes)
    grid = (b, pl.cdiv(m, tn))

    cost = pl.CostEstimate(
        flops=2 * b * m * cin2 * cout2,
        transcendentals=0,
        bytes_accessed=(x_bcm.size * in_bytes
                        + w_scaled.size * in_bytes
                        + shift.size * 4
                        + b * cout2 * m * out_bytes),
    )

    out = pl.pallas_call(
        _conv_bn_relu_kernel,
        out_shape=jax.ShapeDtypeStruct((b, cout2, m), out_dtype),
        grid_spec=pltpu.PrefetchScalarGridSpec(
            num_scalar_prefetch=0,
            grid=grid,
            in_specs=[
                _make_spec((pl.Squeezed(), cin2, tn),
                           lambda i, j: (i, 0, j), io_buffers),
                _make_spec((cout2, cin2), lambda i, j: (0, 0), w_buffers),
                _make_spec((cout2, 1), lambda i, j: (0, 0), w_buffers),
            ],
            out_specs=_make_spec((pl.Squeezed(), cout2, tn),
                                 lambda i, j: (i, 0, j), io_buffers),
        ),
        compiler_params=pltpu.CompilerParams(
            dimension_semantics=("parallel", "parallel"),
            vmem_limit_bytes=vmem_limit,
        ),
        cost_estimate=cost,
    )(x_bcm, w_scaled, shift)
    return out


# ----------------------------------------------------------------------------
# FourierUnit forward (ffc3d=False, fft_norm='ortho')
# ----------------------------------------------------------------------------
def fourier_unit_forward(x, params, *, eps=1e-5, compute_dtype=jnp.bfloat16):
    """x: (B, C, H, W) float32 (NCHW, matching the PyTorch module)."""
    b, c, h, w = x.shape
    conv_w = params["conv_w"]          # (2*Cout, 2*Cin, 1, 1)
    gamma = params["bn_gamma"]         # (2*Cout,)
    beta = params["bn_beta"]           # (2*Cout,)
    run_mean = params["bn_mean"]       # (2*Cout,)
    run_var = params["bn_var"]         # (2*Cout,)

    # rfftn over (H, W), norm='ortho'
    # TODO(synk): no Pallas TPU FFT primitive; use jnp.fft.
    ffted = jnp.fft.rfftn(x, axes=(-2, -1), norm="ortho")   # (B, C, H, Wf) complex
    wf = ffted.shape[-1]

    # torch: stack(real, imag, -1).permute(0,1,4,2,3).view(B, 2C, H, Wf)
    # -> channel layout is (c, ri) interleaved, c-major. Cast once at stack time
    #    so the staging buffer is written in compute_dtype.
    ffted_ri = jnp.stack((ffted.real, ffted.imag), axis=2).astype(compute_dtype)
    cin2 = 2 * c
    x_bcm = ffted_ri.reshape(b, cin2, h * wf)    # fold spatial dims (free reshape)

    cout2 = conv_w.shape[0]
    cout = cout2 // 2

    # Fold BN (inference / running stats) into the conv weight + a shift.
    inv_std = 1.0 / jnp.sqrt(run_var + eps)
    scale = gamma * inv_std                                  # (2Cout,)
    shift = beta - run_mean * scale                          # (2Cout,)
    w_scaled = conv_w.reshape(cout2, cin2) * scale[:, None]  # (2Cout, 2Cin)

    # Reorder OUTPUT channels from interleaved (Cout, 2) to split (2, Cout):
    # all real rows [0,2,4,...] first, then all imag rows [1,3,5,...]. The
    # complex re-assembly below then needs only contiguous half-slices
    # (no materialized transpose after the kernel).
    perm = np.concatenate([np.arange(cout) * 2, np.arange(cout) * 2 + 1])
    w_split = w_scaled[perm]                                 # (2Cout, 2Cin)
    shift_split = shift[perm].reshape(cout2, 1)              # (2Cout, 1)

    # --- Pallas hot path: 1x1 conv (as W @ X) + BN shift + ReLU ---
    y = conv_bn_relu_pallas(x_bcm, w_split, shift_split,
                            compute_dtype=compute_dtype)     # (B, 2Cout, M)

    # (B, 2, Cout, H, Wf): [:, 0] = real block, [:, 1] = imag block
    y = y.reshape(b, 2, cout, h, wf)
    y_c = jax.lax.complex(y[:, 0].astype(jnp.float32),
                          y[:, 1].astype(jnp.float32))

    # irfftn over (H, W) with s = x.shape[-2:], norm='ortho'
    out = jnp.fft.irfftn(y_c, s=(h, w), axes=(-2, -1), norm="ortho")
    return out.astype(jnp.float32)


# Pure-JAX reference (sanity check), follows the PyTorch module literally.
def _reference_forward(x, params, eps=1e-5):
    b, c, h, w = x.shape
    ffted = jnp.fft.rfftn(x, axes=(-2, -1), norm="ortho")
    wf = ffted.shape[-1]
    ffted_ri = jnp.stack((ffted.real, ffted.imag), axis=2).reshape(b, 2 * c, h, wf)
    conv_w = params["conv_w"].reshape(params["conv_w"].shape[0], 2 * c)
    y = jnp.einsum("oc,bchw->bohw", conv_w, ffted_ri)
    scale = params["bn_gamma"] / jnp.sqrt(params["bn_var"] + eps)
    shift = params["bn_beta"] - params["bn_mean"] * scale
    y = y * scale[None, :, None, None] + shift[None, :, None, None]
    y = jnp.maximum(y, 0.0)
    cout = y.shape[1] // 2
    y = y.reshape(b, cout, 2, h, wf).transpose(0, 1, 3, 4, 2)
    y_c = jax.lax.complex(y[..., 0], y[..., 1])
    return jnp.fft.irfftn(y_c, s=(h, w), axes=(-2, -1), norm="ortho")


def init_params(key, in_channels, out_channels):
    k_conv, k_gamma, k_beta = jax.random.split(key, 3)
    cin2, cout2 = 2 * in_channels, 2 * out_channels
    conv_w = jax.random.normal(k_conv, (cout2, cin2, 1, 1), jnp.float32) * (
        1.0 / jnp.sqrt(cin2)
    )
    return {
        "conv_w": conv_w,
        "bn_gamma": 1.0 + 0.1 * jax.random.normal(k_gamma, (cout2,), jnp.float32),
        "bn_beta": 0.1 * jax.random.normal(k_beta, (cout2,), jnp.float32),
        "bn_mean": jnp.zeros((cout2,), jnp.float32),
        "bn_var": jnp.ones((cout2,), jnp.float32),
    }


if __name__ == "__main__":
    key = jax.random.PRNGKey(0)
    k_x, k_p = jax.random.split(key)

    B, C_IN, C_OUT, H, W = 2, 4, 4, 16, 16
    x = jax.random.normal(k_x, (B, C_IN, H, W), jnp.float32)
    params = init_params(k_p, C_IN, C_OUT)

    ref = jax.block_until_ready(_reference_forward(x, params))

    # f32 compute path: tight tolerance proves the fused kernel math and the
    # real/imag channel-permutation bookkeeping.
    fwd_f32 = jax.jit(
        functools.partial(fourier_unit_forward, compute_dtype=jnp.float32)
    )
    out_f32 = jax.block_until_ready(fwd_f32(x, params))
    assert out_f32.shape == (B, C_OUT, H, W)
    assert jnp.allclose(out_f32, ref, rtol=1e-3, atol=1e-3)

    # bf16 compute path (default, fast): looser tolerance for bf16 in/out rounding.
    fwd = jax.jit(fourier_unit_forward)
    out = jax.block_until_ready(fwd(x, params))
    assert out.shape == (B, C_OUT, H, W)
    assert jnp.allclose(out, ref, rtol=3e-2, atol=3e-2)

    print("KERNEL_OK")
</pallas_src>

<mosaic_0001>
module attributes {stable_mosaic.version = 11 : i64} {
  func.func @_conv_bn_relu_kernel(%arg0: i32, %arg1: i32, %arg2: memref<1x8x144xf32, #tpu.memory_space<vmem>>, %arg3: memref<8x8xf32, #tpu.memory_space<vmem>>, %arg4: memref<8x1xf32, #tpu.memory_space<vmem>>, %arg5: memref<1x8x144xf32, #tpu.memory_space<vmem>>) attributes {dimension_semantics = [#tpu.dimension_semantics<parallel>, #tpu.dimension_semantics<parallel>], iteration_bounds = array<i64: 2, 1>, scalar_prefetch = 0 : i64, scratch_operands = 0 : i64, tpu.core_type = #tpu.core_type<tc>, window_params = [{transform_indices = @transform_0, window_bounds = array<i64: 1, 8, 144>}, {pipeline_mode = #tpu.pipeline_mode<synchronous>, transform_indices = @transform_1, window_bounds = array<i64: 8, 8>}, {pipeline_mode = #tpu.pipeline_mode<synchronous>, transform_indices = @transform_2, window_bounds = array<i64: 8, 1>}, {transform_indices = @transform_3, window_bounds = array<i64: 1, 8, 144>}]} {
    %c0 = arith.constant 0 : index
    %c0_0 = arith.constant 0 : index
    %0 = vector.load %arg3[%c0, %c0_0] : memref<8x8xf32, #tpu.memory_space<vmem>>, vector<8x8xf32>
    %c0_1 = arith.constant 0 : index
    %c0_2 = arith.constant 0 : index
    %c0_3 = arith.constant 0 : index
    %1 = vector.load %arg2[%c0_1, %c0_2, %c0_3] : memref<1x8x144xf32, #tpu.memory_space<vmem>>, vector<1x8x144xf32>
    %2 = vector.shape_cast %1 : vector<1x8x144xf32> to vector<8x144xf32>
    %cst = arith.constant dense<0.000000e+00> : vector<8x144xf32>
    %3 = tpu.matmul %0, %2, %cst {dimension_numbers = #tpu.dot_dimension_numbers<[1], [0], [0], [1], [0, 0, 1, 1], [], []>} : vector<8x8xf32>, vector<8x144xf32>, vector<8x144xf32> -> vector<8x144xf32>
    %c0_4 = arith.constant 0 : index
    %c0_5 = arith.constant 0 : index
    %4 = vector.load %arg4[%c0_4, %c0_5] : memref<8x1xf32, #tpu.memory_space<vmem>>, vector<8x1xf32>
    %5 = vector.broadcast %4 : vector<8x1xf32> to vector<8x144xf32>
    %6 = arith.addf %3, %5 : vector<8x144xf32>
    %cst_6 = arith.constant 0.000000e+00 : f32
    %7 = vector.broadcast %cst_6 : f32 to vector<8x144xf32>
    %8 = arith.maximumf %6, %7 : vector<8x144xf32>
    %c0_7 = arith.constant 0 : index
    %c0_8 = arith.constant 0 : index
    %c0_9 = arith.constant 0 : index
    %9 = vector.load %arg5[%c0_7, %c0_8, %c0_9] : memref<1x8x144xf32, #tpu.memory_space<vmem>>, vector<1x8x144xf32>
    %10 = vector.shape_cast %9 : vector<1x8x144xf32> to vector<8x144xf32>
    %11 = vector.shape_cast %8 : vector<8x144xf32> to vector<1x8x144xf32>
    tpu.vector_store %arg5[%c0_7, %c0_8, %c0_9], %11 {strides = array<i32>} : memref<1x8x144xf32, #tpu.memory_space<vmem>>, vector<1x8x144xf32>,
    return
  }
  func.func @transform_0(%arg0: i32, %arg1: i32) -> (i32, i32, i32) {
    %c0_i32 = arith.constant 0 : i32
    %c0_i32_0 = arith.constant 0 : i32
    return %arg0, %c0_i32, %arg1 : i32, i32, i32
  }
  func.func @transform_1(%arg0: i32, %arg1: i32) -> (i32, i32) {
    %c0_i32 = arith.constant 0 : i32
    %c0_i32_0 = arith.constant 0 : i32
    %c0_i32_1 = arith.constant 0 : i32
    return %c0_i32, %c0_i32_0 : i32, i32
  }
  func.func @transform_2(%arg0: i32, %arg1: i32) -> (i32, i32) {
    %c0_i32 = arith.constant 0 : i32
    %c0_i32_0 = arith.constant 0 : i32
    %c0_i32_1 = arith.constant 0 : i32
    return %c0_i32, %c0_i32_0 : i32, i32
  }
  func.func @transform_3(%arg0: i32, %arg1: i32) -> (i32, i32, i32) {
    %c0_i32 = arith.constant 0 : i32
    %c0_i32_0 = arith.constant 0 : i32
    return %arg0, %c0_i32, %arg1 : i32, i32, i32
  }
}

</mosaic_0001>

<bundles_post_ra>
// kernel: reverse.0
= control target key start
LH: loop header
LB: loop body
LE: loop exit
PB: predicated region body
PF: predicated region fallthrough
CT: control target
= control target key end

     0   :  { %v72_v3 = vlaneseq  ;;  %v65_v9 = vld [vmem:[#allocation0 + $0x7] ss:$-1 sm:$0xff]  ;;  %v79_v12 = vld [vmem:[#allocation0 + $0x17] ss:$-1 sm:$0xff]  ;;  %s331_s0 = inlined_call_operand.vmem [shape: f32[2,4,16,7], index: 0, kind: input, shape index: {}]   ;;  %s332_s1 = inlined_call_operand.vmem [shape: f32[2,4,16,7], index: 1, kind: output, shape index: {}]  }
   0x1   :  { %v45_v0 = vld [vmem:[%s331_s0] sm:$0xff]  ;;  %v47_v1 = vld [vmem:[%s331_s0 + $0x8] sm:$0xff]  ;;  %v49_v2 = vld [vmem:[%s331_s0 + $0x10] sm:$0xff]  ;;  %v66_v10 = vrot.slane %v65_v9, 1  ;;  %v80_v14 = vrot.slane %v79_v12, 1 }
   0x2   :  { %46 = vst [vmem:[#allocation0 + $0x8] sm:$0xff] %v45_v0  ;;  %48 = vst [vmem:[#allocation0 + $0x18] sm:$0xff] %v47_v1  ;;  %v51_v4 = vld [vmem:[%s331_s0 + $0x18] sm:$0xff]  ;;  %v53_v5 = vld [vmem:[%s331_s0 + $0x20] sm:$0xff]  ;;  %v73_v11 = vshrl.u32 %v72_v3, 7 }
   0x3   :  { %50 = vst [vmem:[#allocation0 + $0x28] sm:$0xff] %v49_v2  ;;  %v55_v6 = vld [vmem:[%s331_s0 + $0x28] sm:$0xff]  ;;  %52 = vst [vmem:[#allocation0 + $0x38] sm:$0xff] %v51_v4  ;;  %v57_v7 = vld [vmem:[%s331_s0 + $0x30] sm:$0xff] }
   0x4   :  { %54 = vst [vmem:[#allocation0 + $0x48] sm:$0xff] %v53_v5  ;;  %56 = vst [vmem:[#allocation0 + $0x58] sm:$0xff] %v55_v6  ;;  %v59_v8 = vld [vmem:[%s331_s0 + $0x38] sm:$0xff]  ;;  %v93_v13 = vld [vmem:[#allocation0 + $0x27] ss:$-1 sm:$0xff]  ;;  %vm74_vm0 = vcmp.lt.s32.totalorder %v73_v11, 7 }
   0x5   :  { %58 = vst [vmem:[#allocation0 + $0x68] sm:$0xff] %v57_v7  ;;  %60 = vst [vmem:[#allocation0 + $0x78] sm:$0xff] %v59_v8  ;;  %v94_v15 = vrot.slane %v93_v13, 1  ;;  %v107_v16 = vld [vmem:[#allocation0 + $0x37] ss:$-1 sm:$0xff] }
   0x6   :  { %67 = vst [vmem:[#allocation1] sm:$0xff] %v66_v10  ;;  %v108_v17 = vrot.slane %v107_v16, 1  ;;  %v121_v18 = vld [vmem:[#allocation0 + $0x47] ss:$-1 sm:$0xff]  ;;  %v135_v19 = vld [vmem:[#allocation0 + $0x57] ss:$-1 sm:$0xff] }
   0x7   :  { %81 = vst [vmem:[#allocation1 + $0x8] sm:$0xff] %v80_v14  ;;  %95 = vst [vmem:[#allocation1 + $0x10] sm:$0xff] %v94_v15  ;;  %v122_v20 = vrot.slane %v121_v18, 1  ;;  %v136_v21 = vrot.slane %v135_v19, 1  ;;  %v149_v22 = vld [vmem:[#allocation0 + $0x67] ss:$-1 sm:$0xff] }
   0x8   :  { %v163_v23 = vld [vmem:[#allocation0 + $0x77] ss:$-1 sm:$0xff]  ;;  %109 = vst [vmem:[#allocation1 + $0x18] sm:$0xff] %v108_v17  ;;  %v150_v24 = vrot.slane %v149_v22, 1 }
   0x9   :  { %v164_v25 = vrot.slane %v163_v23, 1  ;;  %v70_v26 = vld [vmem:[#allocation0 + $0xf] ss:$-1 sm:$0xff]  ;;  %v84_v27 = vld [vmem:[#allocation0 + $0x1f] ss:$-1 sm:$0xff]  ;;  %123 = vst [vmem:[#allocation1 + $0x20] sm:$0xff] %v122_v20 }
   0xa   :  { %v98_v28 = vld [vmem:[#allocation0 + $0x2f] ss:$-1 sm:$0xff]  ;;  %137 = vst [vmem:[#allocation1 + $0x28] sm:$0xff] %v136_v21  ;;  %v71_v29 = vrot.slane %v70_v26, 1  ;;  %v85_v30 = vrot.slane %v84_v27, 1  ;;  %151 = vst [vmem:[#allocation1 + $0x30] sm:$0xff] %v150_v24 }
   0xb   :  { %v99_v31 = vrot.slane %v98_v28, 1  ;;  %v112_v32 = vld [vmem:[#allocation0 + $0x3f] ss:$-1 sm:$0xff]  ;;  %165 = vst [vmem:[#allocation1 + $0x38] sm:$0xff] %v164_v25  ;;  %v126_v34 = vld [vmem:[#allocation0 + $0x4f] ss:$-1 sm:$0xff] }
   0xc   :  { %v113_v33 = vrot.slane %v112_v32, 1  ;;  %v140_v35 = vld [vmem:[#allocation0 + $0x5f] ss:$-1 sm:$0xff]  ;;  %75 = vst.msk [vmem:[#allocation1] sm:$0xff] %vm74_vm0, %v71_v29  ;;  %89 = vst.msk [vmem:[#allocation1 + $0x8] sm:$0xff] %vm74_vm0, %v85_v30  ;;  %v127_v36 = vrot.slane %v126_v34, 1 }
   0xd   :  { %103 = vst.msk [vmem:[#allocation1 + $0x10] sm:$0xff] %vm74_vm0, %v99_v31  ;;  %v141_v37 = vrot.slane %v140_v35, 1  ;;  %v154_v38 = vld [vmem:[#allocation0 + $0x6f] ss:$-1 sm:$0xff]  ;;  %v168_v39 = vld [vmem:[#allocation0 + $0x7f] ss:$-1 sm:$0xff] }
   0xe   :  { %117 = vst.msk [vmem:[#allocation1 + $0x18] sm:$0xff] %vm74_vm0, %v113_v33  ;;  %v155_v40 = vrot.slane %v154_v38, 1  ;;  %v169_v41 = vrot.slane %v168_v39, 1  ;;  %131 = vst.msk [vmem:[#allocation1 + $0x20] sm:$0xff] %vm74_vm0, %v127_v36 }
   0xf   :  { %145 = vst.msk [vmem:[#allocation1 + $0x28] sm:$0xff] %vm74_vm0, %v141_v37 }
  0x10   :  { %159 = vst.msk [vmem:[#allocation1 + $0x30] sm:$0xff] %vm74_vm0, %v155_v40  ;;  %173 = vst.msk [vmem:[#allocation1 + $0x38] sm:$0xff] %vm74_vm0, %v169_v41 }
  0x13   :  { %v216_v42 = vld [vmem:[#allocation1] sm:$0xff]  ;;  %v218_v43 = vld [vmem:[#allocation1 + $0x8] sm:$0xff] }
  0x14   :  { %v220_v44 = vld [vmem:[#allocation1 + $0x10] sm:$0xff]  ;;  %217 = vst [vmem:[%s332_s1] sm:$0xff] %v216_v42  ;;  %219 = vst [vmem:[%s332_s1 + $0x8] sm:$0xff] %v218_v43 }
  0x15   :  { %221 = vst [vmem:[%s332_s1 + $0x10] sm:$0xff] %v220_v44  ;;  %v222_v45 = vld [vmem:[#allocation1 + $0x18] sm:$0xff]  ;;  %v224_v46 = vld [vmem:[#allocation1 + $0x20] sm:$0xff] }
  0x16   :  { %223 = vst [vmem:[%s332_s1 + $0x18] sm:$0xff] %v222_v45  ;;  %v226_v47 = vld [vmem:[#allocation1 + $0x28] sm:$0xff]  ;;  %225 = vst [vmem:[%s332_s1 + $0x20] sm:$0xff] %v224_v46 }
  0x17   :  { %227 = vst [vmem:[%s332_s1 + $0x28] sm:$0xff] %v226_v47  ;;  %v228_v48 = vld [vmem:[#allocation1 + $0x30] sm:$0xff]  ;;  %v230_v49 = vld [vmem:[#allocation1 + $0x38] sm:$0xff] }
  0x18   :  { %229 = vst [vmem:[%s332_s1 + $0x30] sm:$0xff] %v228_v48  ;;  %231 = vst [vmem:[%s332_s1 + $0x38] sm:$0xff] %v230_v49 }

// kernel: fourier_unit_forward.1
= control target key start
LH: loop header
LB: loop body
LE: loop exit
PB: predicated region body
PF: predicated region fallthrough
CT: control target
= control target key end

     0   :  { %s473_s12 = smov 0   ;;  %s475_s13 = smov 0   ;;  %s512_s0 = inlined_call_operand.vmem [shape: f32[2,8,144], index: 0, kind: input, shape index: {}]   ;;  %s513_s1 = inlined_call_operand.vmem [shape: f32[8,8], index: 1, kind: input, shape index: {}]   ;;  %s514_s2 = inlined_call_operand.vmem [shape: f32[8,1], index: 2, kind: input, shape index: {}]   ;;  %s515_s3 = inlined_call_operand.vmem [shape: f32[2,8,144], index: 3, kind: output, shape index: {}]  }
   0x1   :  { %s477_s14 = smov 0  }
   0x2 LB: > { %s25_s15 = sadd.s32 1, %s445_s13  ;;  %p390_p0 = scmp.ge.s32.totalorder %s449_s14, 1  ;;  %s449_s14 = sphi %s477_s14, %s13_s14   ;;  %s445_s13 = sphi %s475_s13, %s517_s13   ;;  %s441_s12 = sphi %s473_s12, %s516_s12  }
   0x3   : > { %p27_p1 = scmp.ge.s32.totalorder %s25_s15, 2  ;;  %p158_p2 = scmp.lt.s32.totalorder %s449_s14, 3 }
   0x5   : > { %s519_s15 = smov (%p27_p1, %s25_s15), 0  ;;  %p159_p3 = pnand %p390_p0, %p158_p2 }
   0x6   : > { %p191_p4 = scmp.lt.s32.totalorder (!%p159_p3), %s441_s12, 1 }
   0x7   : > { %162 = sbr.rel (%p159_p3) target bundleno = 218 (0xda), region = 32 }
   0xc   : > { %v213_v0 = vld [vmem:[%s514_s2] sm:$0xff]  ;;  %v451_v1 = vmov 0.0   ;;  %v452_v2 = vmov 0   ;;  %s521_s12 = smov (!%p191_p4, %s441_s12), 1  ;;  %vm219_vm0 = vcmask 64512   ;;  %vm297_vm1 = vcmask 130048  }
   0xd   : > { %287 = vmatprep.mubr.f32.mxu0 %v451_v1  ;;  %426 = vset.pattern.permute.xlu0 %v452_v2  ;;  %s398_s18 = sshll.u32 %s521_s12, 4  ;;  %v210_v5 = vld [vmem:[%s513_s1] sm:$0xff] }
   0xe   : > { %216 = vperm.xlu0 %426, %v213_v0   ;;  %s198_s21 = scalar_lea.vmem %s512_s0, %s398_s18  ;;  %s208_s26 = scalar_lea.vmem %s515_s3, %s398_s18 }
   0xf   : > { %v212_v3 = vld [vmem:[%s198_s21 + $0x8] sm:$0xff]  ;;  %v211_v4 = vld [vmem:[%s198_s21] sm:$0xff] }
  0x10   : > { %253 = vmatprep.subr.mxu0 %v212_v3 }
  0x11   : > { %254 = vmatpush1.msra.mxu0 %v211_v4 }
  0x12   : > { %395 = vmatmul.mubr.msk.f32.vlgmr.msra.gmra.mxu0 %vm219_vm0, %v210_v5 }
  0x89   : > { %v217_v6 = vpop.permute.xlu0 %216 }
  0xd2   : > { %v289_v7 = vpop.f32.mrf.mxu0 }
  0xd3   : > { %v290_v8 = vadd.f32 %v289_v7, %v217_v6 }
  0xd4   : > { %v291_v9 = vpop.f32.mrf.mxu0 }
  0xd5   : > { %v294_v10 = vmax.f32 %v290_v8, 0.0  ;;  %v292_v11 = vadd.f32 %v291_v9, %v217_v6 }
  0xd7   : > { %296 = vst [vmem:[%s208_s26] sm:$0xff] %v294_v10  ;;  %v295_v12 = vmax.f32 %v292_v11, 0.0 }
  0xd9   : > { %298 = vst.msk [vmem:[%s208_s26 + $0x8] sm:$0xff] %vm297_vm1, %v295_v12 }
  0xda PF: > { %s13_s14 = sadd.s32 1, %s449_s14   ;;  %s516_s12 = smov %s445_s13 }
  0xdb   : > { %p10_p5 = scmp.ge.s32.totalorder %s13_s14, 4   ;;  %s517_s13 = smov %s519_s15 }
  0xdd   :  { %12 = sbr.rel (!%p10_p5) target bundleno = 2 (0x2), region = 62 }

</bundles_post_ra>
